<compile_context>
chip_gen: v5e
topology: v5e:2x2
jax: 0.10.0
libtpu: 0.0.40
codegen_flags: <defaults>
</compile_context>

<pallas_src>
import functools

import jax
import jax.numpy as jnp
from jax.experimental import pallas as pl
from jax.experimental.pallas import tpu as pltpu


def _vq_kernel(x_ref, cbta_ref, q_ref, idx_ref, ltok_ref):
    """One (batch, spatial-tile) grid step against the full (padded) codebook.

    x_ref:    [1, D, ts]  latent vectors, channels on sublanes, tokens on lanes
    cbta_ref: [Da, Kp]    augmented codebook (f32):
                            rows 0..D-1 : codebook^T
                            row  D      : 0.5*||c_k||^2   (padded k: 1e30)
                            row  D+1    : 1.0             (padded k: 0.0)
                            rows D+2..  : 0.0
    q_ref:    [1, D, ts]  quantized output tile
    idx_ref:  [1, 1, ts]  int32 nearest-codebook index (lane-dense)
    ltok_ref: [1, 1, ts]  per-token sum of squared error (lane-dense)
    """
    d_lat = x_ref.shape[1]
    ts = x_ref.shape[2]
    cbta = cbta_ref[...]                                   # [Da, Kp] f32
    da, kp = cbta.shape
    na = da - d_lat                                        # augmentation rows

    x_t = x_ref[0]                                         # [D, ts]
    xf = x_t.astype(jnp.float32)

    # Augmented token block [-x ; 1 ; 0.5*||x||^2 ; 0 ...] so one MXU matmul
    # yields d[k,t] = 0.5*||c_k||^2 - x_t.c_k + 0.5*||x_t||^2 = 0.5*||x-c||^2 >= 0.
    xsq = 0.5 * jnp.sum(xf * xf, axis=0, keepdims=True)               # [1, ts]
    rid = jax.lax.broadcasted_iota(jnp.int32, (na, ts), 0)
    extra = jnp.where(rid == 0, jnp.float32(1.0),
                      jnp.where(rid == 1, xsq, jnp.float32(0.0)))     # [na, ts]
    x_aug = jnp.concatenate([-xf, extra], axis=0)                     # [Da, ts]

    # Scores on the MXU, bias rows folded in (contract over the row axis).
    d = jax.lax.dot_general(cbta, x_aug,
                            dimension_numbers=(((0,), (0,)), ((), ())),
                            preferred_element_type=jnp.float32)       # [Kp, ts]

    # Fused min + first-occurrence argmin: distances are >= 0 so their f32 bit
    # patterns are order-preserving as int32; pack the row index into the low
    # mantissa bits and take a single min over the codebook axis.
    nbits = max(1, (kp - 1).bit_length())
    mask = (1 << nbits) - 1
    bits = pltpu.bitcast(d, jnp.int32)                                # [Kp, ts]
    iota_k = jax.lax.broadcasted_iota(jnp.int32, (kp, ts), 0)
    packed = jnp.bitwise_or(jnp.bitwise_and(bits, jnp.int32(~mask)), iota_k)
    win = jnp.min(packed, axis=0, keepdims=True)                      # [1, ts]
    idx = jnp.bitwise_and(win, jnp.int32(mask))                       # [1, ts]

    # Exact one-hot (packed values are unique per column) -> MXU gather.
    onehot = (packed == win).astype(jnp.float32)                      # [Kp, ts]
    quant = jnp.dot(cbta[0:d_lat, :], onehot,
                    preferred_element_type=jnp.float32)               # [D, ts]

    q_ref[0] = quant.astype(q_ref.dtype)
    idx_ref[0] = idx

    diff = xf - quant
    ltok_ref[0] = jnp.sum(diff * diff, axis=0, keepdims=True)         # [1, ts]


def _largest_div_tile(hw, cap):
    """Largest multiple of 128 that divides hw (hw is a multiple of 128)."""
    t = min(cap, hw)
    t = max(128, (t // 128) * 128)
    while t > 128 and hw % t != 0:
        t -= 128
    return t


def _pick_spatial_tile(hw, target, batch):
    if hw <= 128:
        return hw
    ts = _largest_div_tile(hw, target)
    # Megacore: ensure >= 2 grid steps so both v7x TensorCores get work.
    if batch * (hw // ts) < 2:
        ts = _largest_div_tile(hw, max(128, ts // 2))
    return ts


@functools.partial(jax.jit, static_argnames=("tile_spatial",))
def quantizer_forward(x, codebook, *, tile_spatial=1024):
    """Pallas implementation of quantizer.forward.

    x:        [B, lat, H, W]  (NCHW, like the PyTorch module)
    codebook: [K, lat]
    returns (out_quant [B, lat, H, W], min_enc_idx [B, H, W],
             codebook_loss scalar, commitment_loss scalar)
    """
    B, lat, H, W = x.shape
    K, D = codebook.shape
    assert D == lat
    HW = H * W

    x3u = x.reshape(B, lat, HW)        # free reshape, tokens stay in NCHW order

    # Pad spatial axis to a multiple of 128 lanes when needed (lane-dense
    # unmasked stores, bounded VMEM). Padded tokens are dropped below.
    if HW > 128 and HW % 128 != 0:
        HWp = ((HW + 127) // 128) * 128
        x3 = jnp.pad(x3u, ((0, 0), (0, 0), (0, HWp - HW)))
    else:
        HWp = HW
        x3 = x3u

    # --- codebook prep, done once in the wrapper ---
    Kp = max(128, ((K + 127) // 128) * 128)       # minimal 128-lane padding
    Da = ((lat + 2 + 7) // 8) * 8                 # codebook rows + bias + ones
    cb_f32 = codebook.astype(jnp.float32)
    c2h = 0.5 * jnp.sum(cb_f32 * cb_f32, axis=1)                      # [K]
    cbta = jnp.zeros((Da, Kp), jnp.float32)
    cbta = cbta.at[:lat, :K].set(cb_f32.T)
    cbta = cbta.at[lat, :K].set(c2h)
    cbta = cbta.at[lat, K:].set(jnp.float32(1e30))   # padded codes never win
    cbta = cbta.at[lat + 1, :K].set(jnp.float32(1.0))

    # Spatial tile: bounded by the requested target and by a VMEM budget for
    # the live [Kp, ts] f32 intermediates (v7x-safe).
    budget = 24 * 1024 * 1024
    kp_cap = max(128, (budget // (20 * Kp)) // 128 * 128)
    ts = _pick_spatial_tile(HWp, min(tile_spatial, kp_cap), B)
    grid = (B, HWp // ts)

    itemsize = jnp.dtype(x.dtype).itemsize
    footprint = (4 * lat * ts * itemsize          # x/q tiles, double-buffered
                 + Da * Kp * 4                    # codebook, single-buffered
                 + 5 * Kp * ts * 4                # live [Kp, ts] intermediates
                 + 4 * lat * ts * 4               # x_aug / quant / diff temps
                 + 8 * ts * 4)                    # idx / ltok tiles
    vmem_limit = int(min(max(2 * footprint, 32 * 1024 * 1024),
                         64 * 1024 * 1024))

    quant3, idx3, ltok = pl.pallas_call(
        _vq_kernel,
        out_shape=(
            jax.ShapeDtypeStruct((B, lat, HWp), x.dtype),
            jax.ShapeDtypeStruct((B, 1, HWp), jnp.int32),
            jax.ShapeDtypeStruct((B, 1, HWp), jnp.float32),
        ),
        grid_spec=pltpu.PrefetchScalarGridSpec(
            num_scalar_prefetch=0,
            grid=grid,
            in_specs=[
                pl.BlockSpec((1, lat, ts), lambda b, s: (b, 0, s)),   # x tile
                pl.BlockSpec((Da, Kp), lambda b, s: (0, 0),
                             pipeline_mode=pl.Buffered(1)),           # codebook
            ],
            out_specs=[
                pl.BlockSpec((1, lat, ts), lambda b, s: (b, 0, s)),   # quantized
                pl.BlockSpec((1, 1, ts), lambda b, s: (b, 0, s)),     # indices
                pl.BlockSpec((1, 1, ts), lambda b, s: (b, 0, s)),     # loss partials
            ],
        ),
        compiler_params=pltpu.CompilerParams(
            dimension_semantics=("parallel", "parallel"),
            vmem_limit_bytes=vmem_limit),
    )(x3, cbta)

    # drop padded spatial tokens before any reduction / reshape
    quant3 = quant3[:, :, :HW]
    idx3 = idx3[:, :, :HW]
    ltok = ltok[:, :, :HW]

    # codebook / commitment loss share the same forward value: mean((x - q)^2)
    mse = jnp.sum(ltok) / jnp.float32(B * HW * lat)
    codebook_loss = mse      # mean((x.detach() - q)^2)
    commitment_loss = mse    # mean((x - q.detach())^2)

    # straight-through estimator (forward value == quantized vectors)
    # TODO(synk): gradient routing of the detach-based losses / STE is a
    # training-time autodiff concern (needs a custom_vjp around pallas_call);
    # only the forward values are produced here.
    out_quant = (jax.lax.stop_gradient(quant3 - x3u) + x3u).reshape(B, lat, H, W)
    min_enc_idx = idx3.reshape(B, H, W)
    return out_quant, min_enc_idx, codebook_loss, commitment_loss


if __name__ == "__main__":
    # config = {'codebook_size': 64, 'latent_dim': 32}
    B, lat, H, W = 2, 32, 16, 16
    codebook_size = 64

    key = jax.random.PRNGKey(0)
    kx, kc = jax.random.split(key)
    x = jax.random.normal(kx, (B, lat, H, W), dtype=jnp.float32)
    # nn.Embedding default init: N(0, 1)
    codebook = jax.random.normal(kc, (codebook_size, lat), dtype=jnp.float32)

    out_quant, min_enc_idx, cb_loss, commit_loss = quantizer_forward(
        x, codebook)
    jax.block_until_ready((out_quant, min_enc_idx, cb_loss, commit_loss))

    assert out_quant.shape == (B, lat, H, W)
    assert min_enc_idx.shape == (B, H, W)
    assert cb_loss.shape == () and commit_loss.shape == ()

    # internal consistency: quantized vectors equal the selected codebook rows
    idx_flat = min_enc_idx.reshape(-1)
    gathered = jnp.take(codebook, idx_flat, axis=0)               # [N, lat]
    ref_q = jnp.transpose(gathered.reshape(B, H, W, lat), (0, 3, 1, 2))
    assert jnp.allclose(out_quant, ref_q, atol=1e-5, rtol=1e-5)

    # losses equal the MSE against the selected codes
    ref_mse = jnp.mean((x - ref_q) ** 2)
    assert jnp.allclose(cb_loss, ref_mse, atol=1e-4, rtol=1e-4)

    # near-optimality of the argmin (tolerant to the packed low-mantissa bits)
    x_tok = jnp.transpose(x, (0, 2, 3, 1)).reshape(-1, lat)       # [N, lat]
    d_all = jnp.sum((x_tok[:, None, :] - codebook[None, :, :]) ** 2, axis=-1)
    d_min = jnp.min(d_all, axis=-1)
    d_sel = jnp.take_along_axis(d_all, idx_flat[:, None], axis=-1)[:, 0]
    assert bool(jnp.all(d_sel <= d_min + 1e-3 * (1.0 + d_min)))

    print("KERNEL_OK")
</pallas_src>

<mosaic_0001>
module attributes {stable_mosaic.version = 11 : i64} {
  func.func @_vq_kernel(%arg0: i32, %arg1: i32, %arg2: memref<1x32x256xf32, #tpu.memory_space<vmem>>, %arg3: memref<40x128xf32, #tpu.memory_space<vmem>>, %arg4: memref<1x32x256xf32, #tpu.memory_space<vmem>>, %arg5: memref<1x1x256xi32, #tpu.memory_space<vmem>>, %arg6: memref<1x1x256xf32, #tpu.memory_space<vmem>>) attributes {dimension_semantics = [#tpu.dimension_semantics<parallel>, #tpu.dimension_semantics<parallel>], iteration_bounds = array<i64: 2, 1>, scalar_prefetch = 0 : i64, scratch_operands = 0 : i64, tpu.core_type = #tpu.core_type<tc>, window_params = [{transform_indices = @transform_0, window_bounds = array<i64: 1, 32, 256>}, {pipeline_mode = #tpu.pipeline_mode<synchronous>, transform_indices = @transform_1, window_bounds = array<i64: 40, 128>}, {transform_indices = @transform_2, window_bounds = array<i64: 1, 32, 256>}, {transform_indices = @transform_3, window_bounds = array<i64: 1, 1, 256>}, {transform_indices = @transform_4, window_bounds = array<i64: 1, 1, 256>}]} {
    %c0 = arith.constant 0 : index
    %c0_0 = arith.constant 0 : index
    %0 = vector.load %arg3[%c0, %c0_0] : memref<40x128xf32, #tpu.memory_space<vmem>>, vector<40x128xf32>
    %c0_1 = arith.constant 0 : index
    %c0_2 = arith.constant 0 : index
    %c0_3 = arith.constant 0 : index
    %1 = vector.load %arg2[%c0_1, %c0_2, %c0_3] : memref<1x32x256xf32, #tpu.memory_space<vmem>>, vector<1x32x256xf32>
    %2 = vector.shape_cast %1 : vector<1x32x256xf32> to vector<32x256xf32>
    %3 = arith.mulf %2, %2 : vector<32x256xf32>
    %cst = arith.constant dense<0.000000e+00> : vector<256xf32>
    %4 = vector.multi_reduction <add>, %3, %cst [0] : vector<32x256xf32> to vector<256xf32>
    %5 = vector.shape_cast %4 : vector<256xf32> to vector<1x256xf32>
    %cst_4 = arith.constant 5.000000e-01 : f32
    %6 = vector.broadcast %cst_4 : f32 to vector<1x256xf32>
    %7 = arith.mulf %6, %5 : vector<1x256xf32>
    %8 = tpu.iota {dimensions = array<i32: 0>} : vector<8x256xi32>
    %c0_i32 = arith.constant 0 : i32
    %9 = vector.broadcast %c0_i32 : i32 to vector<8x256xi32>
    %10 = arith.cmpi eq, %8, %9 : vector<8x256xi32>
    %c1_i32 = arith.constant 1 : i32
    %11 = vector.broadcast %c1_i32 : i32 to vector<8x256xi32>
    %12 = arith.cmpi eq, %8, %11 : vector<8x256xi32>
    %cst_5 = arith.constant 0.000000e+00 : f32
    %13 = vector.shape_cast %7 : vector<1x256xf32> to vector<1x256xf32>
    %14 = vector.broadcast %13 : vector<1x256xf32> to vector<8x256xf32>
    %15 = vector.broadcast %cst_5 : f32 to vector<8x256xf32>
    %16 = arith.select %12, %14, %15 : vector<8x256xi1>, vector<8x256xf32>
    %cst_6 = arith.constant 1.000000e+00 : f32
    %17 = vector.broadcast %cst_6 : f32 to vector<8x256xf32>
    %18 = arith.select %10, %17, %16 : vector<8x256xi1>, vector<8x256xf32>
    %cst_7 = arith.constant 0.000000e+00 : f32
    %19 = vector.broadcast %cst_7 : f32 to vector<32x256xf32>
    %20 = arith.subf %19, %2 : vector<32x256xf32>
    %21 = tpu.concatenate %20, %18 in 0 : vector<32x256xf32>, vector<8x256xf32> -> vector<40x256xf32>
    %cst_8 = arith.constant dense<0.000000e+00> : vector<128x256xf32>
    %22 = tpu.matmul %0, %21, %cst_8 {dimension_numbers = #tpu.dot_dimension_numbers<[0], [0], [1], [1], [0, 1, 1, 1], [], []>} : vector<40x128xf32>, vector<40x256xf32>, vector<128x256xf32> -> vector<128x256xf32>
    %23 = tpu.bitcast %22 : vector<128x256xf32> -> vector<128x256xi32>
    %24 = tpu.iota {dimensions = array<i32: 0>} : vector<128x256xi32>
    %c-128_i32 = arith.constant -128 : i32
    %25 = vector.broadcast %c-128_i32 : i32 to vector<128x256xi32>
    %26 = arith.andi %23, %25 : vector<128x256xi32>
    %27 = arith.ori %26, %24 : vector<128x256xi32>
    %cst_9 = arith.constant dense<2147483647> : vector<256xi32>
    %28 = vector.multi_reduction <minsi>, %27, %cst_9 [0] : vector<128x256xi32> to vector<256xi32>
    %29 = vector.shape_cast %28 : vector<256xi32> to vector<1x256xi32>
    %c127_i32 = arith.constant 127 : i32
    %30 = vector.broadcast %c127_i32 : i32 to vector<1x256xi32>
    %31 = arith.andi %29, %30 : vector<1x256xi32>
    %32 = vector.broadcast %29 : vector<1x256xi32> to vector<128x256xi32>
    %33 = arith.cmpi eq, %27, %32 : vector<128x256xi32>
    %34 = arith.extui %33 : vector<128x256xi1> to vector<128x256xi32>
    %35 = arith.sitofp %34 : vector<128x256xi32> to vector<128x256xf32>
    %36 = vector.extract_strided_slice %0 {offsets = [0, 0], sizes = [32, 128], strides = [1, 1]} : vector<40x128xf32> to vector<32x128xf32>
    %cst_10 = arith.constant dense<0.000000e+00> : vector<32x256xf32>
    %37 = tpu.matmul %36, %35, %cst_10 {dimension_numbers = #tpu.dot_dimension_numbers<[1], [0], [0], [1], [0, 0, 1, 1], [], []>} : vector<32x128xf32>, vector<128x256xf32>, vector<32x256xf32> -> vector<32x256xf32>
    %c0_11 = arith.constant 0 : index
    %c0_12 = arith.constant 0 : index
    %c0_13 = arith.constant 0 : index
    %38 = vector.load %arg4[%c0_11, %c0_12, %c0_13] : memref<1x32x256xf32, #tpu.memory_space<vmem>>, vector<1x32x256xf32>
    %39 = vector.shape_cast %38 : vector<1x32x256xf32> to vector<32x256xf32>
    %40 = vector.shape_cast %37 : vector<32x256xf32> to vector<1x32x256xf32>
    tpu.vector_store %arg4[%c0_11, %c0_12, %c0_13], %40 {strides = array<i32>} : memref<1x32x256xf32, #tpu.memory_space<vmem>>, vector<1x32x256xf32>,
    %c0_14 = arith.constant 0 : index
    %c0_15 = arith.constant 0 : index
    %c0_16 = arith.constant 0 : index
    %41 = vector.load %arg5[%c0_14, %c0_15, %c0_16] : memref<1x1x256xi32, #tpu.memory_space<vmem>>, vector<1x1x256xi32>
    %42 = vector.shape_cast %41 : vector<1x1x256xi32> to vector<1x256xi32>
    %43 = vector.shape_cast %31 : vector<1x256xi32> to vector<1x1x256xi32>
    tpu.vector_store %arg5[%c0_14, %c0_15, %c0_16], %43 {strides = array<i32>} : memref<1x1x256xi32, #tpu.memory_space<vmem>>, vector<1x1x256xi32>,
    %44 = arith.subf %2, %37 : vector<32x256xf32>
    %45 = arith.mulf %44, %44 : vector<32x256xf32>
    %cst_17 = arith.constant dense<0.000000e+00> : vector<256xf32>
    %46 = vector.multi_reduction <add>, %45, %cst_17 [0] : vector<32x256xf32> to vector<256xf32>
    %47 = vector.shape_cast %46 : vector<256xf32> to vector<1x256xf32>
    %c0_18 = arith.constant 0 : index
    %c0_19 = arith.constant 0 : index
    %c0_20 = arith.constant 0 : index
    %48 = vector.load %arg6[%c0_18, %c0_19, %c0_20] : memref<1x1x256xf32, #tpu.memory_space<vmem>>, vector<1x1x256xf32>
    %49 = vector.shape_cast %48 : vector<1x1x256xf32> to vector<1x256xf32>
    %50 = vector.shape_cast %47 : vector<1x256xf32> to vector<1x1x256xf32>
    tpu.vector_store %arg6[%c0_18, %c0_19, %c0_20], %50 {strides = array<i32>} : memref<1x1x256xf32, #tpu.memory_space<vmem>>, vector<1x1x256xf32>,
    return
  }
  func.func @transform_0(%arg0: i32, %arg1: i32) -> (i32, i32, i32) {
    %c0_i32 = arith.constant 0 : i32
    %c0_i32_0 = arith.constant 0 : i32
    return %arg0, %c0_i32, %arg1 : i32, i32, i32
  }
  func.func @transform_1(%arg0: i32, %arg1: i32) -> (i32, i32) {
    %c0_i32 = arith.constant 0 : i32
    %c0_i32_0 = arith.constant 0 : i32
    %c0_i32_1 = arith.constant 0 : i32
    return %c0_i32, %c0_i32_0 : i32, i32
  }
  func.func @transform_2(%arg0: i32, %arg1: i32) -> (i32, i32, i32) {
    %c0_i32 = arith.constant 0 : i32
    %c0_i32_0 = arith.constant 0 : i32
    return %arg0, %c0_i32, %arg1 : i32, i32, i32
  }
  func.func @transform_3(%arg0: i32, %arg1: i32) -> (i32, i32, i32) {
    %c0_i32 = arith.constant 0 : i32
    %c0_i32_0 = arith.constant 0 : i32
    return %arg0, %c0_i32, %arg1 : i32, i32, i32
  }
  func.func @transform_4(%arg0: i32, %arg1: i32) -> (i32, i32, i32) {
    %c0_i32 = arith.constant 0 : i32
    %c0_i32_0 = arith.constant 0 : i32
    return %arg0, %c0_i32, %arg1 : i32, i32, i32
  }
}

</mosaic_0001>

<bundles_post_ra>
// kernel: quantizer_forward.1
= control target key start
LH: loop header
LB: loop body
LE: loop exit
PB: predicated region body
PF: predicated region fallthrough
CT: control target
= control target key end

     0   :  { %s1321_s15 = smov 0   ;;  %s1323_s16 = smov 0   ;;  %s1780_s0 = inlined_call_operand.vmem [shape: f32[2,32,256], index: 0, kind: input, shape index: {}]   ;;  %s1781_s1 = inlined_call_operand.vmem [shape: f32[40,128], index: 1, kind: input, shape index: {}]   ;;  %s1782_s2 = inlined_call_operand.vmem [shape: f32[2,32,256], index: 2, kind: output, shape index: {0}]   ;;  %s1783_s3 = inlined_call_operand.vmem [shape: s32[2,1,256], index: 3, kind: output, shape index: {1}]   ;;  %s1784_s4 = inlined_call_operand.vmem [shape: f32[2,1,256], index: 4, kind: output, shape index: {2}]  }
   0x1   :  { %s1325_s17 = smov 0  }
   0x2 LB: > { %s27_s18 = sadd.s32 1, %s1289_s16  ;;  %p1128_p0 = scmp.ge.s32.totalorder %s1293_s17, 1  ;;  %s1293_s17 = sphi %s1325_s17, %s15_s17   ;;  %s1289_s16 = sphi %s1323_s16, %s1788_s16   ;;  %s1285_s15 = sphi %s1321_s15, %s1787_s15  }
   0x3   : > { %p29_p1 = scmp.ge.s32.totalorder %s27_s18, 2  ;;  %p192_p2 = scmp.lt.s32.totalorder %s1293_s17, 3 }
   0x5   : > { %s1790_s18 = smov (%p29_p1, %s27_s18), 0  ;;  %p193_p3 = pnand %p1128_p0, %p192_p2 }
   0x6   : > { %p243_p4 = scmp.lt.s32.totalorder (!%p193_p3), %s1285_s15, 1 }
   0x7   : > { %196 = sbr.rel (%p193_p3) target bundleno = 660 (0x294), region = 28 }
   0xc   : > { %v1342_v0 = vld [vmem:[%s1781_s1] sm:$0xff]  ;;  %s1792_s15 = smov (!%p243_p4, %s1285_s15), 1  ;;  %v1351_v1 = vld [vmem:[%s1781_s1 + $0x8] sm:$0xff]  ;;  %v1394_v23 = vld [vmem:[%s1781_s1 + $0x10] sm:$0xff]  ;;  %v321_v28 = vlaneseq  ;;  %vm369_vm2 = vcmask 326656  }
   0xd   : > { %337 = vxpose.xlu0.b32.start [1/5] (short) %v1342_v0, 128  ;;  %s1233_s21 = sshll.u32 %s1792_s15, 6  ;;  %v1400_v33 = vld [vmem:[%s1781_s1 + $0x18] sm:$0xff]  ;;  %v284_v44 = vld [vmem:[%s1781_s1 + $0x20] sm:$0xff]  ;;  %s1133_s7 = sshll.u32 %s1792_s15, 1 }
   0xe   : > { %s250_s26 = scalar_lea.vmem %s1780_s0, %s1233_s21  ;;  %v1403_v34 = vshrl.u32 %v321_v28, 7  ;;  %s269_s10 = scalar_lea.vmem %s1783_s3, %s1133_s7 }
   0xf   : > { %v1358_v2 = vld [vmem:[%s250_s26] sm:$0xff]  ;;  %v1360_v3 = vld [vmem:[%s250_s26 + $0x10] sm:$0xff]  ;;  %v1372_v9 = vld [vmem:[%s250_s26 + $0x8] sm:$0xff]  ;;  %s1745_s13 = scalar_lea.vmem %s1782_s2, %s1233_s21  ;;  %s278_s20 = scalar_lea.vmem %s1784_s4, %s1133_s7 }
  0x10   : > { %v1362_v4 = vld [vmem:[%s250_s26 + $0x20] sm:$0xff]  ;;  %v1364_v5 = vld [vmem:[%s250_s26 + $0x30] sm:$0xff]  ;;  %v293_v6 = vmul.f32 %v1358_v2, %v1358_v2  ;;  %v295_v7 = vmul.f32 %v1360_v3, %v1360_v3  ;;  %v1374_v10 = vld [vmem:[%s250_s26 + $0x18] sm:$0xff]  ;;  %v294_v13 = vmul.f32 %v1372_v9, %v1372_v9  ;;  %vm324_vm0 = vcmp.eq.s32.totalorder %v1403_v34, 1 }
  0x11   : > { %v297_v8 = vmul.f32 %v1362_v4, %v1362_v4  ;;  %v1376_v11 = vld [vmem:[%s250_s26 + $0x28] sm:$0xff]  ;;  %v1378_v12 = vld [vmem:[%s250_s26 + $0x38] sm:$0xff]  ;;  %v296_v14 = vmul.f32 %v1374_v10, %v1374_v10  ;;  %v299_v15 = vmul.f32 %v1364_v5, %v1364_v5  ;;  %vm323_vm1 = vcmp.eq.s32.totalorder %v1403_v34, 0 }
  0x12   : > { %v301_v16 = vadd.f32 %v295_v7, %v293_v6  ;;  %v298_v17 = vmul.f32 %v1376_v11, %v1376_v11  ;;  %v300_v18 = vmul.f32 %v1378_v12, %v1378_v12  ;;  %v335_v43 = vsub.f32 0.0, %v1364_v5 }
  0x13   : > { %v310_v19 = vadd.f32 %v296_v14, %v294_v13  ;;  %v336_v47 = vsub.f32 0.0, %v1378_v12  ;;  %v333_v49 = vsub.f32 0.0, %v1362_v4  ;;  %v334_v50 = vsub.f32 0.0, %v1376_v11 }
  0x14   : > { %v302_v20 = vadd.f32 %v301_v16, %v297_v8  ;;  %v331_v51 = vsub.f32 0.0, %v1360_v3  ;;  %v332_v52 = vsub.f32 0.0, %v1374_v10  ;;  %v329_v53 = vsub.f32 0.0, %v1358_v2 }
  0x15   : > { %338 = vxpose.xlu0.b32.cont [2/5] (short) %v1351_v1, 128  ;;  %v311_v21 = vadd.f32 %v310_v19, %v298_v17  ;;  %v330_v54 = vsub.f32 0.0, %v1372_v9 }
  0x16   : > { %v303_v22 = vadd.f32 %v302_v20, %v299_v15 }
  0x17   : > { %v312_v24 = vadd.f32 %v311_v21, %v300_v18 }
  0x18   : > { %v304_v25 = vrot.slane %v303_v22, 4 }
  0x19   : > { %v313_v26 = vrot.slane %v312_v24, 4 }
  0x1a   : > { %v305_v27 = vadd.f32 %v304_v25, %v303_v22 }
  0x1b   : > { %v314_v29 = vadd.f32 %v313_v26, %v312_v24 }
  0x1c   : > { %v306_v30 = vrot.slane %v305_v27, 2 }
  0x1d   : > { %339 = vxpose.xlu0.b32.cont [3/5] (short) %v1394_v23, 128  ;;  %v315_v31 = vrot.slane %v314_v29, 2 }
  0x1e   : > { %v307_v32 = vadd.f32 %v306_v30, %v305_v27 }
  0x1f   : > { %v316_v35 = vadd.f32 %v315_v31, %v314_v29 }
  0x20   : > { %v308_v36 = vrot.slane %v307_v32, 1 }
  0x21   : > { %v317_v37 = vrot.slane %v316_v35, 1 }
  0x22   : > { %v309_v38 = vadd.f32 %v308_v36, %v307_v32 }
  0x23   : > { %v318_v39 = vadd.f32 %v317_v37, %v316_v35 }
  0x24   : > { %v319_v40 = vmul.f32 0.5, %v309_v38 }
  0x25   : > { %340 = vxpose.xlu0.b32.cont [4/5] (short) %v1400_v33, 128  ;;  %v320_v41 = vmul.f32 0.5, %v318_v39  ;;  %v581_v39 = vadd.s32 16, %v1403_v34 }
  0x26   : > { %v325_v42 = vsel %vm324_vm0, %v319_v40, 0.0 }
  0x27   : > { %v327_v45 = vsel %vm323_vm1, 1.0, %v325_v42  ;;  %v326_v46 = vsel %vm324_vm0, %v320_v41, 0.0 }
  0x28   : > { %429 = vmatpush.msra.mxu0 %v327_v45  ;;  %v328_v48 = vsel %vm323_vm1, 1.0, %v326_v46  ;;  %1235 = vmatpush.msra.mxu2 %v327_v45 }
  0x29   : > { %494 = vmatpush.msra.mxu1 %v328_v48  ;;  %1240 = vmatpush.msra.mxu3 %v328_v48  ;;  %v582_v48 = vadd.s32 24, %v1403_v34 }
  0x2a   : > { %430 = vmatpush.msra.mxu0 %v335_v43  ;;  %1236 = vmatpush.msra.mxu2 %v335_v43 }
  0x2b   : > { %495 = vmatpush.msra.mxu1 %v336_v47  ;;  %1241 = vmatpush.msra.mxu3 %v336_v47 }
  0x2c   : > { %431 = vmatpush.msra.mxu0 %v333_v49  ;;  %1237 = vmatpush.msra.mxu2 %v333_v49 }
  0x2d   : > { %341 = vxpose.xlu0.b32.end [5/5] (short) %v284_v44, 128  ;;  %496 = vmatpush.msra.mxu1 %v334_v50 }
  0x2e   : > { %1242 = vmatpush.msra.mxu3 %v334_v50  ;;  %432 = vmatpush.msra.mxu0 %v331_v51 }
  0x2f   : > { %497 = vmatpush.msra.mxu1 %v332_v52  ;;  %1238 = vmatpush.msra.mxu2 %v331_v51  ;;  %v583_v51 = vadd.s32 32, %v1403_v34 }
  0x30   : > { %1243 = vmatpush.msra.mxu3 %v332_v52  ;;  %433 = vmatpush.msra.mxu0 %v329_v53 }
  0x31   : > { %498 = vmatpush.msra.mxu1 %v330_v54  ;;  %1239 = vmatpush.msra.mxu2 %v329_v53 }
  0x32   : > { %1244 = vmatpush.msra.mxu3 %v330_v54 }
  0xb1   : > { %v353_v55 = vpop.trf.xlu0 }
  0xb2   : > { %1135 = vmatmul.msk.f32.vlgmr.msra.gmra.mxu0 %vm369_vm2, %v353_v55  ;;  %1151 = vmatmul.msk.f32.vlgmr.msra.gmra.mxu1 %vm369_vm2, %v353_v55 }
  0xb9   : > { %v354_v56 = vpop.trf.xlu0 }
  0xba   : > { %1136 = vmatmul.msk.f32.gmra.mxu0 %vm369_vm2, %v354_v56  ;;  %1152 = vmatmul.msk.f32.gmra.mxu1 %vm369_vm2, %v354_v56 }
  0xc1   : > { %v355_v57 = vpop.trf.xlu0 }
  0xc2   : > { %1137 = vmatmul.msk.f32.gmra.mxu0 %vm369_vm2, %v355_v57  ;;  %1153 = vmatmul.msk.f32.gmra.mxu1 %vm369_vm2, %v355_v57  ;;  %v580_v57 = vadd.s32 8, %v1403_v34 }
  0xc9   : > { %v356_v58 = vpop.trf.xlu0 }
  0xca   : > { %1138 = vmatmul.msk.f32.gmra.mxu0 %vm369_vm2, %v356_v58  ;;  %1154 = vmatmul.msk.f32.gmra.mxu1 %vm369_vm2, %v356_v58 }
  0xd1   : > { %v357_v59 = vpop.trf.xlu0 }
  0xd2   : > { %1139 = vmatmul.msk.f32.gmra.mxu0 %vm369_vm2, %v357_v59  ;;  %1155 = vmatmul.msk.f32.gmra.mxu1 %vm369_vm2, %v357_v59 }
  0xd9   : > { %v358_v60 = vpop.trf.xlu0 }
  0xda   : > { %1140 = vmatmul.msk.f32.gmra.mxu0 %vm369_vm2, %v358_v60  ;;  %1156 = vmatmul.msk.f32.gmra.mxu1 %vm369_vm2, %v358_v60  ;;  %v584_v60 = vadd.s32 40, %v1403_v34 }
  0xe1   : > { %v359_v61 = vpop.trf.xlu0 }
  0xe2   : > { %1141 = vmatmul.msk.f32.gmra.mxu0 %vm369_vm2, %v359_v61  ;;  %1157 = vmatmul.msk.f32.gmra.mxu1 %vm369_vm2, %v359_v61 }
  0xe9   : > { %v360_v62 = vpop.trf.xlu0 }
  0xea   : > { %1142 = vmatmul.msk.f32.gmra.mxu0 %vm369_vm2, %v360_v62  ;;  %1158 = vmatmul.msk.f32.gmra.mxu1 %vm369_vm2, %v360_v62 }
  0xf1   : > { %v361_v63 = vpop.trf.xlu0 }
  0xf2   : > { %1143 = vmatmul.msk.f32.gmra.mxu0 %vm369_vm2, %v361_v63  ;;  %1159 = vmatmul.msk.f32.gmra.mxu1 %vm369_vm2, %v361_v63 }
  0xf9   : > { %v362_v6 = vpop.trf.xlu0 }
  0xfa   : > { %1144 = vmatmul.msk.f32.gmra.mxu0 %vm369_vm2, %v362_v6  ;;  %1160 = vmatmul.msk.f32.gmra.mxu1 %vm369_vm2, %v362_v6 }
 0x101   : > { %v363_v7 = vpop.trf.xlu0 }
 0x102   : > { %1145 = vmatmul.msk.f32.gmra.mxu0 %vm369_vm2, %v363_v7  ;;  %1161 = vmatmul.msk.f32.vlgmr.msra.gmra.mxu3 %vm369_vm2, %v363_v7 }
 0x109   : > { %v364_v8 = vpop.trf.xlu0 }
 0x10a   : > { %1146 = vmatmul.msk.f32.vlgmr.msra.gmra.mxu2 %vm369_vm2, %v364_v8  ;;  %1162 = vmatmul.msk.f32.gmra.mxu3 %vm369_vm2, %v364_v8 }
 0x111   : > { %v365_v13 = vpop.trf.xlu0 }
 0x112   : > { %1147 = vmatmul.msk.f32.gmra.mxu2 %vm369_vm2, %v365_v13  ;;  %1163 = vmatmul.msk.f32.gmra.mxu3 %vm369_vm2, %v365_v13 }
 0x119   : > { %v366_v14 = vpop.trf.xlu0 }
 0x11a   : > { %1148 = vmatmul.msk.f32.gmra.mxu2 %vm369_vm2, %v366_v14  ;;  %1164 = vmatmul.msk.f32.gmra.mxu3 %vm369_vm2, %v366_v14 }
 0x121   : > { %v367_v15 = vpop.trf.xlu0 }
 0x122   : > { %1149 = vmatmul.msk.f32.gmra.mxu2 %vm369_vm2, %v367_v15  ;;  %1165 = vmatmul.msk.f32.gmra.mxu3 %vm369_vm2, %v367_v15 }
 0x129   : > { %v368_v16 = vpop.trf.xlu0 }
 0x12a   : > { %1150 = vmatmul.msk.f32.gmra.mxu2 %vm369_vm2, %v368_v16  ;;  %1166 = vmatmul.msk.f32.gmra.mxu3 %vm369_vm2, %v368_v16  ;;  %v585_v16 = vadd.s32 48, %v1403_v34 }
 0x12f   : > { %v435_v17 = vpop.f32.mrf.mxu0  ;;  %v500_v18 = vpop.f32.mrf.mxu1 }
 0x130   : > { %v595_v42 = vand.u32 4294967168, %v435_v17  ;;  %v596_v43 = vand.u32 4294967168, %v500_v18 }
 0x132   : > { %v1471_v53 = vor.u32 %v595_v42, %v1403_v34  ;;  %v1474_v54 = vor.u32 %v596_v43, %v1403_v34 }
 0x137   : > { %v438_v19 = vpop.f32.mrf.mxu0  ;;  %v503_v20 = vpop.f32.mrf.mxu1 }
 0x138   : > { %v597_v58 = vand.u32 4294967168, %v438_v19  ;;  %v598_v59 = vand.u32 4294967168, %v503_v20 }
 0x13a   : > { %v1490_v14 = vor.u32 %v597_v58, %v580_v57  ;;  %v1492_v15 = vor.u32 %v598_v59, %v580_v57 }
 0x13f   : > { %v441_v21 = vpop.f32.mrf.mxu0  ;;  %v506_v22 = vpop.f32.mrf.mxu1 }
 0x140   : > { %v599_v40 = vand.u32 4294967168, %v441_v21  ;;  %v600_v41 = vand.u32 4294967168, %v506_v22 }
 0x142   : > { %v1464_v46 = vor.u32 %v599_v40, %v581_v39  ;;  %v1466_v47 = vor.u32 %v600_v41, %v581_v39 }
 0x144   : > { %vm659_vm3 = vcmp.lt.s32.totalorder %v1471_v53, %v1464_v46  ;;  %vm698_vm4 = vcmp.lt.s32.totalorder %v1474_v54, %v1466_v47 }
 0x145   : > { %v660_v20 = vsel %vm659_vm3, %v1471_v53, %v1464_v46  ;;  %v699_v21 = vsel %vm698_vm4, %v1474_v54, %v1466_v47 }
 0x147   : > { %v444_v24 = vpop.f32.mrf.mxu0  ;;  %v509_v25 = vpop.f32.mrf.mxu1 }
 0x148   : > { %v601_v49 = vand.u32 4294967168, %v444_v24  ;;  %v602_v50 = vand.u32 4294967168, %v509_v25  ;;  %v586_v24 = vadd.s32 56, %v1403_v34 }
 0x14a   : > { %v1482_v62 = vor.u32 %v601_v49, %v582_v48  ;;  %v1484_v63 = vor.u32 %v602_v50, %v582_v48  ;;  %v588_v49 = vadd.s32 72, %v1403_v34 }
 0x14c   : > { %vm661_vm5 = vcmp.lt.s32.totalorder %v1490_v14, %v1482_v62  ;;  %vm700_vm6 = vcmp.lt.s32.totalorder %v1492_v15, %v1484_v63 }
 0x14d   : > { %v662_v39 = vsel %vm661_vm5, %v1490_v14, %v1482_v62  ;;  %v701_v43 = vsel %vm700_vm6, %v1492_v15, %v1484_v63 }
 0x14f   : > { %v447_v26 = vpop.f32.mrf.mxu0  ;;  %v512_v27 = vpop.f32.mrf.mxu1 }
 0x150   : > { %v603_v52 = vand.u32 4294967168, %v447_v26  ;;  %v604_v55 = vand.u32 4294967168, %v512_v27 }
 0x152   : > { %v1486_v6 = vor.u32 %v603_v52, %v583_v51  ;;  %v1488_v8 = vor.u32 %v604_v55, %v583_v51 }
 0x154   : > { %vm663_vm7 = vcmp.lt.s32.totalorder %v660_v20, %v1486_v6  ;;  %vm702_vm8 = vcmp.lt.s32.totalorder %v699_v21, %v1488_v8 }
 0x157   : > { %v450_v29 = vpop.f32.mrf.mxu0  ;;  %v515_v30 = vpop.f32.mrf.mxu1 }
 0x158   : > { %v605_v7 = vand.u32 4294967168, %v450_v29  ;;  %v606_v13 = vand.u32 4294967168, %v515_v30 }
 0x15a   : > { %v1515_v25 = vor.u32 %v605_v7, %v584_v60  ;;  %v1518_v26 = vor.u32 %v606_v13, %v584_v60  ;;  %v589_v7 = vadd.s32 80, %v1403_v34 }
 0x15c   : > { %vm665_vm9 = vcmp.lt.s32.totalorder %v662_v39, %v1515_v25  ;;  %vm704_vm10 = vcmp.lt.s32.totalorder %v701_v43, %v1518_v26 }
 0x15d   : > { %v666_v58 = vsel %vm665_vm9, %v662_v39, %v1515_v25  ;;  %v705_v60 = vsel %vm704_vm10, %v701_v43, %v1518_v26 }
 0x15f   : > { %v453_v31 = vpop.f32.mrf.mxu0  ;;  %v518_v32 = vpop.f32.mrf.mxu1 }
 0x160   : > { %v607_v17 = vand.u32 4294967168, %v453_v31  ;;  %v608_v22 = vand.u32 4294967168, %v518_v32  ;;  %v587_v31 = vadd.s32 64, %v1403_v34 }
 0x162   : > { %v1522_v30 = vor.u32 %v607_v17, %v585_v16  ;;  %v1528_v40 = vor.u32 %v608_v22, %v585_v16  ;;  %v590_v22 = vadd.s32 88, %v1403_v34 }
 0x167   : > { %v1451_v35 = vpop.f32.mrf.mxu0  ;;  %v1455_v37 = vpop.f32.mrf.mxu1 }
 0x168   : > { %v609_v27 = vand.u32 4294967168, %v1451_v35  ;;  %v610_v29 = vand.u32 4294967168, %v1455_v37  ;;  %v664_v35 = vsel %vm663_vm7, %v660_v20, %v1486_v6  ;;  %v703_v37 = vsel %vm702_vm8, %v699_v21, %v1488_v8 }
 0x169   : > { %vm667_vm11 = vcmp.lt.s32.totalorder %v664_v35, %v1522_v30  ;;  %vm706_vm12 = vcmp.lt.s32.totalorder %v703_v37, %v1528_v40 }
 0x16a   : > { %v1536_v48 = vor.u32 %v609_v27, %v586_v24  ;;  %v668_v17 = vsel %vm667_vm11, %v664_v35, %v1522_v30 }
 0x16c   : > { %vm669_vm13 = vcmp.lt.s32.totalorder %v666_v58, %v1536_v48 }
 0x16d   : > { %v670_v27 = vsel %vm669_vm13, %v666_v58, %v1536_v48 }
 0x16f   : > { %v1457_v38 = vpop.f32.mrf.mxu0  ;;  %v524_v56 = vpop.f32.mrf.mxu1 }
 0x170   : > { %v611_v32 = vand.u32 4294967168, %v1457_v38  ;;  %v612_v41 = vand.u32 4294967168, %v524_v56  ;;  %v1538_v38 = vor.u32 %v610_v29, %v586_v24 }
 0x172   : > { %v1542_v51 = vor.u32 %v611_v32, %v587_v31  ;;  %v1546_v59 = vor.u32 %v612_v41, %v587_v31  ;;  %vm708_vm14 = vcmp.lt.s32.totalorder %v705_v60, %v1538_v38  ;;  %v591_v41 = vadd.s32 96, %v1403_v34 }
 0x173   : > { %v709_v29 = vsel %vm708_vm14, %v705_v60, %v1538_v38 }
 0x174   : > { %vm671_vm15 = vcmp.lt.s32.totalorder %v668_v17, %v1542_v51 }
 0x175   : > { %v672_v39 = vsel %vm671_vm15, %v668_v17, %v1542_v51 }
 0x177   : > { %v462_v61 = vpop.f32.mrf.mxu0  ;;  %v527_v42 = vpop.f32.mrf.mxu1 }
 0x178   : > { %v613_v52 = vand.u32 4294967168, %v462_v61  ;;  %v614_v55 = vand.u32 4294967168, %v527_v42  ;;  %v707_v61 = vsel %vm706_vm12, %v703_v37, %v1528_v40 }
 0x179   : > { %vm710_vm0 = vcmp.lt.s32.totalorder %v707_v61, %v1546_v59 }
 0x17a   : > { %v1556_v20 = vor.u32 %v613_v52, %v588_v49  ;;  %v1558_v21 = vor.u32 %v614_v55, %v588_v49 }
 0x17c   : > { %vm673_vm1 = vcmp.lt.s32.totalorder %v670_v27, %v1556_v20  ;;  %vm712_vm2 = vcmp.lt.s32.totalorder %v709_v29, %v1558_v21 }
 0x17f   : > { %v465_v50 = vpop.f32.mrf.mxu0 }
 0x180   : > { %v615_v13 = vand.u32 4294967168, %v465_v50 }
 0x182   : > { %v1566_v31 = vor.u32 %v615_v13, %v589_v7  ;;  %v674_v13 = vsel %vm673_vm1, %v670_v27, %v1556_v20 }
 0x184   : > { %vm675_vm3 = vcmp.lt.s32.totalorder %v672_v39, %v1566_v31 }
 0x185   : > { %v1453_v36 = vpop.f32.mrf.mxu3  ;;  %v676_v17 = vsel %vm675_vm3, %v672_v39, %v1566_v31 }
 0x186   : > { %v616_v16 = vand.u32 4294967168, %v1453_v36 }
 0x188   : > { %v1568_v32 = vor.u32 %v616_v16, %v589_v7 }
 0x18d   : > { %v1460_v44 = vpop.f32.mrf.mxu2  ;;  %v1462_v45 = vpop.f32.mrf.mxu3 }
 0x18e   : > { %v617_v36 = vand.u32 4294967168, %v1460_v44  ;;  %v618_v24 = vand.u32 4294967168, %v1462_v45  ;;  %v711_v44 = vsel %vm710_vm0, %v707_v61, %v1546_v59  ;;  %v592_v45 = vadd.s32 104, %v1403_v34 }
 0x18f   : > { %vm714_vm4 = vcmp.lt.s32.totalorder %v711_v44, %v1568_v32 }
 0x190   : > { %v1578_v49 = vor.u32 %v617_v36, %v590_v22  ;;  %v1580_v50 = vor.u32 %v618_v24, %v590_v22  ;;  %v715_v61 = vsel %vm714_vm4, %v711_v44, %v1568_v32  ;;  %v594_v22 = vadd.s32 120, %v1403_v34 }
 0x192   : > { %vm677_vm5 = vcmp.lt.s32.totalorder %v674_v13, %v1578_v49 }
 0x193   : > { %v678_v27 = vsel %vm677_vm5, %v674_v13, %v1578_v49 }
 0x195   : > { %v1495_v18 = vpop.f32.mrf.mxu2  ;;  %v1497_v19 = vpop.f32.mrf.mxu3 }
 0x196   : > { %v619_v42 = vand.u32 4294967168, %v1495_v18  ;;  %v620_v43 = vand.u32 4294967168, %v1497_v19  ;;  %v593_v18 = vadd.s32 112, %v1403_v34 }
 0x198   : > { %v1585_v19 = vor.u32 %v619_v42, %v591_v41  ;;  %v1587_v58 = vor.u32 %v620_v43, %v591_v41 }
 0x19a   : > { %vm679_vm7 = vcmp.lt.s32.totalorder %v676_v17, %v1585_v19  ;;  %vm718_vm8 = vcmp.lt.s32.totalorder %v715_v61, %v1587_v58 }
 0x19b   : > { %v680_v34 = vsel %vm679_vm7, %v676_v17, %v1585_v19  ;;  %v719_v44 = vsel %vm718_vm8, %v715_v61, %v1587_v58 }
 0x19d   : > { %v474_v56 = vpop.f32.mrf.mxu2  ;;  %v539_v57 = vpop.f32.mrf.mxu3 }
 0x19e   : > { %v621_v52 = vand.u32 4294967168, %v474_v56  ;;  %v622_v55 = vand.u32 4294967168, %v539_v57  ;;  %v713_v56 = vsel %vm712_vm2, %v709_v29, %v1558_v21 }
 0x19f   : > { %vm716_vm6 = vcmp.lt.s32.totalorder %v713_v56, %v1580_v50 }
 0x1a0   : > { %v1597_v57 = vor.u32 %v621_v52, %v592_v45  ;;  %v1599_v16 = vor.u32 %v622_v55, %v592_v45  ;;  %v717_v29 = vsel %vm716_vm6, %v713_v56, %v1580_v50 }
 0x1a2   : > { %vm681_vm9 = vcmp.lt.s32.totalorder %v678_v27, %v1597_v57  ;;  %vm720_vm10 = vcmp.lt.s32.totalorder %v717_v29, %v1599_v16 }
 0x1a3   : > { %v721_v52 = vsel %vm720_vm10, %v717_v29, %v1599_v16 }
 0x1a5   : > { %v477_v35 = vpop.f32.mrf.mxu2  ;;  %v542_v37 = vpop.f32.mrf.mxu3 }
 0x1a6   : > { %v623_v60 = vand.u32 4294967168, %v477_v35  ;;  %v624_v7 = vand.u32 4294967168, %v542_v37  ;;  %v682_v37 = vsel %vm681_vm9, %v678_v27, %v1597_v57 }
 0x1a8   : > { %v655_v36 = vor.u32 %v623_v60, %v593_v18  ;;  %v656_v24 = vor.u32 %v624_v7, %v593_v18 }
 0x1aa   : > { %vm683_vm11 = vcmp.lt.s32.totalorder %v680_v34, %v655_v36  ;;  %vm722_vm12 = vcmp.lt.s32.totalorder %v719_v44, %v656_v24 }
 0x1ab   : > { %v684_v55 = vsel %vm683_vm11, %v680_v34, %v655_v36  ;;  %v723_v18 = vsel %vm722_vm12, %v719_v44, %v656_v24 }
 0x1ad   : > { %v480_v41 = vpop.f32.mrf.mxu2  ;;  %v545_v42 = vpop.f32.mrf.mxu3 }
 0x1ae   : > { %v625_v39 = vand.u32 4294967168, %v480_v41  ;;  %v626_v43 = vand.u32 4294967168, %v545_v42 }
 0x1b0   : > { %v657_v45 = vor.u32 %v625_v39, %v594_v22  ;;  %v658_v35 = vor.u32 %v626_v43, %v594_v22 }
 0x1b2   : > { %vm685_vm13 = vcmp.lt.s32.totalorder %v682_v37, %v657_v45  ;;  %vm724_vm14 = vcmp.lt.s32.totalorder %v721_v52, %v658_v35 }
 0x1b3   : > { %v686_v60 = vsel %vm685_vm13, %v682_v37, %v657_v45  ;;  %v725_v7 = vsel %vm724_vm14, %v721_v52, %v658_v35  ;;  %v1295_v52 = vmov 1.0  }
 0x1b4   : > { %vm687_vm15 = vcmp.lt.s32.totalorder %v684_v55, %v686_v60  ;;  %vm726_vm0 = vcmp.lt.s32.totalorder %v723_v18, %v725_v7 }
 0x1b5   : > { %v688_v13 = vsel %vm687_vm15, %v684_v55, %v686_v60  ;;  %v727_v56 = vsel %vm726_vm0, %v723_v18, %v725_v7  ;;  %vm902_vm15 = vcmask 1040384   ;;  %vm1647_vm0 = vcmp.lt.s32.totalorder %v321_v28, 256 }
 0x1b6   : > { %v689_v17 = vrot.slane %v688_v13, 4  ;;  %v728_v61 = vrot.slane %v727_v56, 4 }
 0x1b8   : > { %vm690_vm1 = vcmp.lt.s32.totalorder %v688_v13, %v689_v17  ;;  %vm729_vm2 = vcmp.lt.s32.totalorder %v727_v56, %v728_v61 }
 0x1b9   : > { %v691_v41 = vsel %vm690_vm1, %v688_v13, %v689_v17  ;;  %v730_v22 = vsel %vm729_vm2, %v727_v56, %v728_v61 }
 0x1ba   : > { %v692_v42 = vrot.slane %v691_v41, 2  ;;  %v731_v27 = vrot.slane %v730_v22, 2 }
 0x1bc   : > { %vm693_vm3 = vcmp.lt.s32.totalorder %v691_v41, %v692_v42  ;;  %vm732_vm4 = vcmp.lt.s32.totalorder %v730_v22, %v731_v27 }
 0x1bd   : > { %v694_v29 = vsel %vm693_vm3, %v691_v41, %v692_v42  ;;  %v733_v39 = vsel %vm732_vm4, %v730_v22, %v731_v27 }
 0x1be   : > { %v695_v43 = vrot.slane %v694_v29, 1  ;;  %v734_v34 = vrot.slane %v733_v39, 1 }
 0x1c0   : > { %vm696_vm5 = vcmp.lt.s32.totalorder %v694_v29, %v695_v43  ;;  %vm735_vm6 = vcmp.lt.s32.totalorder %v733_v39, %v734_v34 }
 0x1c1   : > { %v1614_v44 = vsel %vm696_vm5, %v694_v29, %v695_v43  ;;  %v1616_v37 = vsel %vm735_vm6, %v733_v39, %v734_v34 }
 0x1c2   : > { %vm769_vm7 = vcmp.eq.s32.totalorder %v657_v45, %v1614_v44  ;;  %vm770_vm8 = vcmp.eq.s32.totalorder %v658_v35, %v1616_v37  ;;  %vm767_vm9 = vcmp.eq.s32.totalorder %v655_v36, %v1614_v44  ;;  %vm768_vm10 = vcmp.eq.s32.totalorder %v656_v24, %v1616_v37 }
 0x1c3   : > { %1199 = vmatpush.msk.msrb.mxu2 %vm769_vm7, %v1295_v52  ;;  %1215 = vmatpush.msk.msrb.mxu3 %vm770_vm8, %v1295_v52  ;;  %v738_v55 = vand.u32 127, %v1616_v37  ;;  %vm765_vm11 = vcmp.eq.s32.totalorder %v1597_v57, %v1614_v44  ;;  %vm766_vm12 = vcmp.eq.s32.totalorder %v1599_v16, %v1616_v37  ;;  %vm763_vm13 = vcmp.eq.s32.totalorder %v1585_v19, %v1614_v44 }
 0x1c4   : > { %vm764_vm14 = vcmp.eq.s32.totalorder %v1587_v58, %v1616_v37  ;;  %v737_v57 = vand.u32 127, %v1614_v44  ;;  %vm761_vm1 = vcmp.eq.s32.totalorder %v1578_v49, %v1614_v44  ;;  %vm762_vm2 = vcmp.eq.s32.totalorder %v1580_v50, %v1616_v37 }
 0x1c5   : > { %1200 = vmatpush.msk.msrb.mxu2 %vm767_vm9, %v1295_v52  ;;  %1216 = vmatpush.msk.msrb.mxu3 %vm768_vm10, %v1295_v52  ;;  %v901_v36 = vrot.slane %v738_v55, 7  ;;  %vm741_vm3 = vcmp.eq.s32.totalorder %v1490_v14, %v1614_v44  ;;  %vm739_vm4 = vcmp.eq.s32.totalorder %v1471_v53, %v1614_v44  ;;  %vm759_vm5 = vcmp.eq.s32.totalorder %v1566_v31, %v1614_v44 }
 0x1c6   : > { %vm760_vm6 = vcmp.eq.s32.totalorder %v1568_v32, %v1616_v37  ;;  %vm757_vm7 = vcmp.eq.s32.totalorder %v1556_v20, %v1614_v44  ;;  %vm758_vm8 = vcmp.eq.s32.totalorder %v1558_v21, %v1616_v37  ;;  %vm755_vm9 = vcmp.eq.s32.totalorder %v1542_v51, %v1614_v44 }
 0x1c7   : > { %1201 = vmatpush.msk.msrb.mxu2 %vm765_vm11, %v1295_v52  ;;  %1217 = vmatpush.msk.msrb.mxu3 %vm766_vm12, %v1295_v52  ;;  %v903_v28 = vsel %vm902_vm15, %v737_v57, %v901_v36  ;;  %vm756_vm10 = vcmp.eq.s32.totalorder %v1546_v59, %v1616_v37  ;;  %vm753_vm11 = vcmp.eq.s32.totalorder %v1536_v48, %v1614_v44 }
 0x1c8   : > { %908 = vst.msk [vmem:[%s269_s10] sm:$0x3] %vm1647_vm0, %v903_v28  ;;  %vm754_vm12 = vcmp.eq.s32.totalorder %v1538_v38, %v1616_v37 }
 0x1c9   : > { %1202 = vmatpush.msk.msrb.mxu2 %vm763_vm13, %v1295_v52  ;;  %1218 = vmatpush.msk.msrb.mxu3 %vm764_vm14, %v1295_v52  ;;  %vm751_vm13 = vcmp.eq.s32.totalorder %v1522_v30, %v1614_v44  ;;  %vm752_vm14 = vcmp.eq.s32.totalorder %v1528_v40, %v1616_v37 }
 0x1cb   : > { %1203 = vmatpush.msk.msrb.mxu2 %vm761_vm1, %v1295_v52  ;;  %1219 = vmatpush.msk.msrb.mxu3 %vm762_vm2, %v1295_v52  ;;  %vm749_vm1 = vcmp.eq.s32.totalorder %v1515_v25, %v1614_v44  ;;  %vm750_vm2 = vcmp.eq.s32.totalorder %v1518_v26, %v1616_v37 }
 0x1cd   : > { %1204 = vmatpush.msk.msrb.mxu2 %vm759_vm5, %v1295_v52  ;;  %1220 = vmatpush.msk.msrb.mxu3 %vm760_vm6, %v1295_v52  ;;  %vm747_vm5 = vcmp.eq.s32.totalorder %v1486_v6, %v1614_v44  ;;  %vm748_vm6 = vcmp.eq.s32.totalorder %v1488_v8, %v1616_v37 }
 0x1cf   : > { %1205 = vmatpush.msk.msrb.mxu2 %vm757_vm7, %v1295_v52  ;;  %1221 = vmatpush.msk.msrb.mxu3 %vm758_vm8, %v1295_v52  ;;  %vm745_vm7 = vcmp.eq.s32.totalorder %v1482_v62, %v1614_v44  ;;  %vm746_vm8 = vcmp.eq.s32.totalorder %v1484_v63, %v1616_v37 }
 0x1d1   : > { %1206 = vmatpush.msk.msrb.mxu2 %vm755_vm9, %v1295_v52  ;;  %1222 = vmatpush.msk.msrb.mxu3 %vm756_vm10, %v1295_v52  ;;  %vm743_vm9 = vcmp.eq.s32.totalorder %v1464_v46, %v1614_v44  ;;  %vm744_vm10 = vcmp.eq.s32.totalorder %v1466_v47, %v1616_v37 }
 0x1d3   : > { %1207 = vmatpush.msk.msrb.mxu2 %vm753_vm11, %v1295_v52  ;;  %1223 = vmatpush.msk.msrb.mxu3 %vm754_vm12, %v1295_v52  ;;  %vm742_vm11 = vcmp.eq.s32.totalorder %v1492_v15, %v1616_v37  ;;  %vm740_vm12 = vcmp.eq.s32.totalorder %v1474_v54, %v1616_v37 }
 0x1d5   : > { %1208 = vmatpush.msk.msrb.mxu2 %vm751_vm13, %v1295_v52  ;;  %1224 = vmatpush.msk.msrb.mxu3 %vm752_vm14, %v1295_v52 }
 0x1d7   : > { %1209 = vmatpush.msk.msrb.mxu2 %vm749_vm1, %v1295_v52  ;;  %1225 = vmatpush.msk.msrb.mxu3 %vm750_vm2, %v1295_v52 }
 0x1d9   : > { %1210 = vmatpush.msk.msrb.mxu2 %vm747_vm5, %v1295_v52  ;;  %1226 = vmatpush.msk.msrb.mxu3 %vm748_vm6, %v1295_v52 }
 0x1db   : > { %1211 = vmatpush.msk.msrb.mxu2 %vm745_vm7, %v1295_v52  ;;  %1227 = vmatpush.msk.msrb.mxu3 %vm746_vm8, %v1295_v52 }
 0x1dd   : > { %1212 = vmatpush.msk.msrb.mxu2 %vm743_vm9, %v1295_v52  ;;  %1228 = vmatpush.msk.msrb.mxu3 %vm744_vm10, %v1295_v52 }
 0x1df   : > { %1213 = vmatpush.msk.msrb.mxu2 %vm741_vm3, %v1295_v52  ;;  %1229 = vmatpush.msk.msrb.mxu3 %vm742_vm11, %v1295_v52 }
 0x1e1   : > { %1214 = vmatpush.msk.msrb.mxu2 %vm739_vm4, %v1295_v52  ;;  %1230 = vmatpush.msk.msrb.mxu3 %vm740_vm12, %v1295_v52 }
 0x1e2   : > { %851 = vmatmul.f32.vlgmr.msrb.gmra.mxu2 %v1342_v0  ;;  %880 = vmatmul.f32.vlgmr.msrb.gmra.mxu3 %v1342_v0 }
 0x1ea   : > { %854 = vmatmul.f32.gmra.mxu2 %v1351_v1  ;;  %883 = vmatmul.f32.gmra.mxu3 %v1351_v1 }
 0x1f2   : > { %857 = vmatmul.f32.gmra.mxu2 %v1394_v23  ;;  %886 = vmatmul.f32.gmra.mxu3 %v1394_v23 }
 0x1fa   : > { %860 = vmatmul.f32.gmra.mxu2 %v1400_v33  ;;  %889 = vmatmul.f32.gmra.mxu3 %v1400_v33 }
 0x265   : > { %v852_v0 = vpop.f32.mrf.mxu2  ;;  %v881_v1 = vpop.f32.mrf.mxu3 }
 0x266   : > { %893 = vst [vmem:[%s1745_s13] sm:$0xff] %v852_v0  ;;  %v909_v62 = vsub.f32 %v1358_v2, %v852_v0  ;;  %v910_v63 = vsub.f32 %v1372_v9, %v881_v1 }
 0x267   : > { %894 = vst [vmem:[%s1745_s13 + $0x8] sm:$0xff] %v881_v1 }
 0x268   : > { %v917_v25 = vmul.f32 %v909_v62, %v909_v62  ;;  %v918_v26 = vmul.f32 %v910_v63, %v910_v63 }
 0x26d   : > { %v855_v23 = vpop.f32.mrf.mxu2  ;;  %v884_v46 = vpop.f32.mrf.mxu3 }
 0x26e   : > { %895 = vst [vmem:[%s1745_s13 + $0x10] sm:$0xff] %v855_v23  ;;  %v911_v53 = vsub.f32 %v1360_v3, %v855_v23  ;;  %v912_v54 = vsub.f32 %v1374_v10, %v884_v46 }
 0x26f   : > { %896 = vst [vmem:[%s1745_s13 + $0x18] sm:$0xff] %v884_v46 }
 0x270   : > { %v919_v14 = vmul.f32 %v911_v53, %v911_v53  ;;  %v920_v15 = vmul.f32 %v912_v54, %v912_v54 }
 0x272   : > { %v925_v48 = vadd.f32 %v919_v14, %v917_v25  ;;  %v934_v38 = vadd.f32 %v920_v15, %v918_v26 }
 0x275   : > { %v858_v33 = vpop.f32.mrf.mxu2  ;;  %v887_v47 = vpop.f32.mrf.mxu3 }
 0x276   : > { %897 = vst [vmem:[%s1745_s13 + $0x20] sm:$0xff] %v858_v33  ;;  %v913_v6 = vsub.f32 %v1362_v4, %v858_v33  ;;  %v914_v8 = vsub.f32 %v1376_v11, %v887_v47 }
 0x277   : > { %898 = vst [vmem:[%s1745_s13 + $0x28] sm:$0xff] %v887_v47 }
 0x278   : > { %v921_v30 = vmul.f32 %v913_v6, %v913_v6  ;;  %v922_v3 = vmul.f32 %v914_v8, %v914_v8 }
 0x27a   : > { %v926_v51 = vadd.f32 %v925_v48, %v921_v30  ;;  %v935_v4 = vadd.f32 %v934_v38, %v922_v3 }
 0x27d   : > { %v861_v40 = vpop.f32.mrf.mxu2  ;;  %v890_v10 = vpop.f32.mrf.mxu3 }
 0x27e   : > { %899 = vst [vmem:[%s1745_s13 + $0x30] sm:$0xff] %v861_v40  ;;  %v915_v2 = vsub.f32 %v1364_v5, %v861_v40  ;;  %v916_v9 = vsub.f32 %v1378_v12, %v890_v10 }
 0x27f   : > { %900 = vst [vmem:[%s1745_s13 + $0x38] sm:$0xff] %v890_v10 }
 0x280   : > { %v923_v59 = vmul.f32 %v915_v2, %v915_v2  ;;  %v924_v11 = vmul.f32 %v916_v9, %v916_v9 }
 0x282   : > { %v927_v20 = vadd.f32 %v926_v51, %v923_v59  ;;  %v936_v21 = vadd.f32 %v935_v4, %v924_v11 }
 0x284   : > { %v928_v31 = vrot.slane %v927_v20, 4  ;;  %v937_v32 = vrot.slane %v936_v21, 4 }
 0x286   : > { %v929_v49 = vadd.f32 %v928_v31, %v927_v20  ;;  %v938_v50 = vadd.f32 %v937_v32, %v936_v21 }
 0x288   : > { %v930_v19 = vrot.slane %v929_v49, 2  ;;  %v939_v58 = vrot.slane %v938_v50, 2 }
 0x28a   : > { %v931_v24 = vadd.f32 %v930_v19, %v929_v49  ;;  %v940_v45 = vadd.f32 %v939_v58, %v938_v50 }
 0x28c   : > { %v932_v35 = vrot.slane %v931_v24, 1  ;;  %v941_v5 = vrot.slane %v940_v45, 1 }
 0x28e   : > { %v942_v18 = vadd.f32 %v941_v5, %v940_v45  ;;  %v933_v12 = vadd.f32 %v932_v35, %v931_v24 }
 0x290   : > { %v945_v60 = vrot.slane %v942_v18, 7 }
 0x292   : > { %v946_v7 = vsel %vm902_vm15, %v933_v12, %v945_v60 }
 0x293   : > { %948 = vst.msk [vmem:[%s278_s20] sm:$0x3] %vm1647_vm0, %v946_v7 }
 0x294 PF: > { %s15_s17 = sadd.s32 1, %s1293_s17   ;;  %s1787_s15 = smov %s1289_s16 }
 0x295   : > { %p12_p5 = scmp.ge.s32.totalorder %s15_s17, 4   ;;  %s1788_s16 = smov %s1790_s18 }
 0x297   :  { %14 = sbr.rel (!%p12_p5) target bundleno = 2 (0x2), region = 82 }

</bundles_post_ra>
